<compile_context>
chip_gen: v7x
topology: tpu7x:2x2x1
jax: 0.10.0
libtpu: 0.0.40
codegen_flags: <defaults>
</compile_context>

<pallas_src>
import functools

import jax
import jax.numpy as jnp
from jax import lax
from jax.experimental import pallas as pl
from jax.experimental.pallas import tpu as pltpu


# ---------------------------------------------------------------------------
# tiling helpers
# ---------------------------------------------------------------------------
def _round_up(x, m):
    return (x + m - 1) // m * m


def _choose_l_tile(L, max_tile):
    """Lane-aligned compute length (multiple of 128) and a bounded L tile dividing it."""
    l_cmp = _round_up(L, 128)
    for t in (1024, 512, 384, 256, 128):
        if t <= max_tile and l_cmp % t == 0:
            return l_cmp, t
    return l_cmp, 128


# ---------------------------------------------------------------------------
# shared conv tile
# ---------------------------------------------------------------------------
def _conv_tile(x_ref, w_ref, *, tl, k, pad, mxu_dtype):
    """Conv1d output tile (C_out, tl) as ONE fused im2col matmul on the MXU.

    x_ref : (1, C_in, L_cmp + 2*pad)  resident padded sample, NCL layout (L on lanes)
    w_ref : (C_out, K*C_in)           im2col-ordered weight, already in mxu_dtype
    """
    start = pl.multiple_of(pl.program_id(1) * tl, 128)         # lane-aligned tile start
    xw = x_ref[0, :, pl.ds(start, tl + 2 * pad)]               # (C_in, tl + 2*pad) f32
    # K shifted views concatenated on the sublane axis -> (K*C_in, tl).
    # Kept in f32 until here for robust lowering; single cast right before the MXU.
    col = jnp.concatenate([xw[:, t:t + tl] for t in range(k)], axis=0)
    return jnp.dot(w_ref[...], col.astype(mxu_dtype),
                   preferred_element_type=jnp.float32)          # (C_out, tl) f32 acc


# ---------------------------------------------------------------------------
# kernels
# ---------------------------------------------------------------------------
def _stats_kernel(x_ref, w_ref, sum_ref, sq_ref, *,
                  tl, k, pad, L, mask_tail, mxu_dtype):
    """Pass A: conv tile + per-sample BN sum / sum-of-squares (accumulated over L tiles)."""
    gl = pl.program_id(1)

    @pl.when(gl == 0)
    def _():
        sum_ref[...] = jnp.zeros_like(sum_ref)
        sq_ref[...] = jnp.zeros_like(sq_ref)

    y = _conv_tile(x_ref, w_ref, tl=tl, k=k, pad=pad, mxu_dtype=mxu_dtype)
    if mask_tail:
        pos = gl * tl + lax.broadcasted_iota(jnp.int32, (1, tl), 1)
        y = jnp.where(pos < L, y, 0.0)
    sum_ref[...] += jnp.sum(y, axis=1, keepdims=True)[None]     # (1, C_out, 1)
    sq_ref[...] += jnp.sum(y * y, axis=1, keepdims=True)[None]


def _pool_gate_kernel(x_ref, w_ref, sums_ref, sqs_ref, gamma_ref, beta_ref,
                      w1t_ref, b1r_ref, w2_ref, b2c_ref,
                      gscale_ref, gshift_ref,
                      scale_sc, shift_sc, pool_sc, *,
                      tl, k, pad, L, cnt, eps, mask_tail, mxu_dtype):
    """Pass B: BN finalize (in-kernel) + relu(BN(conv)) SE pool + SE gate MLP.

    Emits per-(sample, channel) gscale/gshift with the sigmoid gate folded into the
    BN scale/shift so Pass C needs only one FMA.
    """
    gl = pl.program_id(1)

    # -- head: BN finalize + pool reset.  Done at gl==0 of every sample so it is
    #    correct even when the batch axis is sharded across TensorCores (per-core scratch).
    @pl.when(gl == 0)
    def _():
        inv_cnt = jnp.float32(1.0 / cnt)
        mean = jnp.sum(sums_ref[...], axis=0) * inv_cnt                   # (C_out, 1)
        # NOTE: single-pass var = E[y^2] - mean^2 in f32 (clamped); fine for these
        # magnitudes, a shifted/two-pass variance is safer for extreme activations.
        var = jnp.maximum(jnp.sum(sqs_ref[...], axis=0) * inv_cnt - mean * mean, 0.0)
        inv = gamma_ref[...] * lax.rsqrt(var + eps)
        scale_sc[...] = inv
        shift_sc[...] = beta_ref[...] - inv * mean
        pool_sc[...] = jnp.zeros_like(pool_sc)

    y = _conv_tile(x_ref, w_ref, tl=tl, k=k, pad=pad, mxu_dtype=mxu_dtype)
    z = jnp.maximum(y * scale_sc[...] + shift_sc[...], 0.0)               # BN FMA + ReLU
    if mask_tail:
        pos = gl * tl + lax.broadcasted_iota(jnp.int32, (1, tl), 1)
        z = jnp.where(pos < L, z, 0.0)
    pool_sc[...] += jnp.sum(z, axis=1, keepdims=True)                     # (C_out, 1)

    # -- tail: per-sample SE gate, folded into the per-channel FMA coefficients.
    @pl.when(gl == pl.num_programs(1) - 1)
    def _():
        avg = pool_sc[...] * jnp.float32(1.0 / L)                         # (C_out, 1)
        # Tiny MLP via broadcast-multiply + cross-lane/sublane reductions (no
        # transposes, no 1-wide matmuls): weights pre-laid-out host-side.
        h = jnp.maximum(jnp.sum(w1t_ref[...] * avg, axis=0, keepdims=True)
                        + b1r_ref[...], 0.0)                              # (1, C_red)
        g = jax.nn.sigmoid(jnp.sum(w2_ref[...] * h, axis=1, keepdims=True)
                           + b2c_ref[...])                                # (C_out, 1)
        # relu(s*y + b) * g == relu((s*g)*y + b*g) since g >= 0.
        gscale_ref[...] = (scale_sc[...] * g)[None]
        gshift_ref[...] = (shift_sc[...] * g)[None]


def _apply_kernel(x_ref, w_ref, gscale_ref, gshift_ref, o_ref, *,
                  tl, k, pad, mxu_dtype):
    """Pass C: conv + fused (BN * SE-gate) FMA + ReLU; lane-dense (C_out, TL) store."""
    y = _conv_tile(x_ref, w_ref, tl=tl, k=k, pad=pad, mxu_dtype=mxu_dtype)
    z = jnp.maximum(y * gscale_ref[0] + gshift_ref[0], 0.0)               # (C_out, tl)
    o_ref[...] = z[None].astype(o_ref.dtype)


# ---------------------------------------------------------------------------
# wrapper
# ---------------------------------------------------------------------------
def cnn_block_forward(x, params, *, eps=1e-5, l_tile=512, mxu_dtype=jnp.bfloat16):
    """x: (N, C_in, L) float32 (PyTorch NCL). Returns (N, C_out, L) float32."""
    N, C_in, L = x.shape
    w_torch = params["w_conv"]                          # (C_out, C_in, K) torch layout
    C_out, _, K = w_torch.shape
    C_red = params["w_fc1"].shape[0]
    if K % 2 != 1:
        raise NotImplementedError("odd kernel_size ('same' padding) assumed")
    pad = (K - 1) // 2

    L_cmp, TL = _choose_l_tile(L, max(int(l_tile), 128))
    GL = L_cmp // TL
    mask_tail = (L_cmp != L)

    # --- host-side parameter prep (free): im2col weight pre-cast to the MXU dtype
    #     (cast hoisted out of the kernels), column/row-shaped SE params, BN params
    #     as columns.  Conv bias dropped (train-mode BN cancels it exactly).
    w2d = jnp.transpose(w_torch, (0, 2, 1)).reshape(C_out, K * C_in).astype(mxu_dtype)
    gamma_c = params["bn_gamma"].reshape(C_out, 1).astype(jnp.float32)
    beta_c = params["bn_beta"].reshape(C_out, 1).astype(jnp.float32)
    w1t = jnp.transpose(params["w_fc1"]).astype(jnp.float32)              # (C_out, C_red)
    b1r = params["b_fc1"].reshape(1, C_red).astype(jnp.float32)
    w2 = params["w_fc2"].astype(jnp.float32)                              # (C_out, C_red)
    b2c = params["b_fc2"].reshape(C_out, 1).astype(jnp.float32)

    # --- NCL kept end-to-end: pad along L only (conv halo + lane-alignment tail).
    #     No overlapping-window gather; haloing happens in-kernel on the resident slab.
    x_pad = jnp.pad(x.astype(jnp.float32),
                    ((0, 0), (0, 0), (pad, pad + (L_cmp - L))))
    LP = L_cmp + 2 * pad

    x_spec = pl.BlockSpec((1, C_in, LP), lambda gn, gl: (gn, 0, 0))       # resident/sample
    w_spec = pl.BlockSpec((C_out, K * C_in), lambda gn, gl: (0, 0))
    acc_spec = pl.BlockSpec((1, C_out, 1), lambda gn, gl: (gn, 0, 0))

    def full(a):                                                          # tiny resident input
        return pl.BlockSpec(a.shape, lambda gn, gl: (0,) * a.ndim)

    cp_acc = pltpu.CompilerParams(
        dimension_semantics=("parallel", "arbitrary"),                    # L-tiles accumulate
        vmem_limit_bytes=32 * 1024 * 1024)                                # v7x-safe
    cp_par = pltpu.CompilerParams(
        dimension_semantics=("parallel", "parallel"),
        vmem_limit_bytes=32 * 1024 * 1024)

    # ---- Pass A: conv + per-sample BN sum / sum-of-squares over the full (N, L) ----
    sums, sqs = pl.pallas_call(
        functools.partial(_stats_kernel, tl=TL, k=K, pad=pad, L=L,
                          mask_tail=mask_tail, mxu_dtype=mxu_dtype),
        grid=(N, GL),
        in_specs=[x_spec, w_spec],
        out_specs=(acc_spec, acc_spec),
        out_shape=(jax.ShapeDtypeStruct((N, C_out, 1), jnp.float32),
                   jax.ShapeDtypeStruct((N, C_out, 1), jnp.float32)),
        compiler_params=cp_acc,
    )(x_pad, w2d)

    # ---- Pass B: BN finalize + SE pool + SE gate MLP, all in one pallas_call ----
    gscale, gshift = pl.pallas_call(
        functools.partial(_pool_gate_kernel, tl=TL, k=K, pad=pad, L=L,
                          cnt=float(N * L), eps=float(eps),
                          mask_tail=mask_tail, mxu_dtype=mxu_dtype),
        grid=(N, GL),
        in_specs=[x_spec, w_spec, full(sums), full(sqs), full(gamma_c), full(beta_c),
                  full(w1t), full(b1r), full(w2), full(b2c)],
        out_specs=(acc_spec, acc_spec),
        out_shape=(jax.ShapeDtypeStruct((N, C_out, 1), jnp.float32),
                   jax.ShapeDtypeStruct((N, C_out, 1), jnp.float32)),
        scratch_shapes=[pltpu.VMEM((C_out, 1), jnp.float32),              # scale
                        pltpu.VMEM((C_out, 1), jnp.float32),              # shift
                        pltpu.VMEM((C_out, 1), jnp.float32)],             # pool
        compiler_params=cp_acc,
    )(x_pad, w2d, sums, sqs, gamma_c, beta_c, w1t, b1r, w2, b2c)

    # ---- Pass C: conv + fused FMA + ReLU, lane-dense (C_out, TL) writes ----
    out = pl.pallas_call(
        functools.partial(_apply_kernel, tl=TL, k=K, pad=pad, mxu_dtype=mxu_dtype),
        grid=(N, GL),
        in_specs=[x_spec, w_spec, acc_spec, acc_spec],
        out_specs=pl.BlockSpec((1, C_out, TL), lambda gn, gl: (gn, 0, gl)),
        out_shape=jax.ShapeDtypeStruct((N, C_out, L_cmp), jnp.float32),
        compiler_params=cp_par,
    )(x_pad, w2d, gscale, gshift)

    return out[:, :, :L] if mask_tail else out


# ---------------------------------------------------------------------------
# parameters / pure-JAX reference
# ---------------------------------------------------------------------------
def make_params(key, in_channels, out_channels, kernel_size, reduction_ratio):
    c_red = out_channels // reduction_ratio
    ks = jax.random.split(key, 6)
    s = 0.1
    return {
        # torch-native layouts
        "w_conv": s * jax.random.normal(ks[0], (out_channels, in_channels, kernel_size), jnp.float32),
        "b_conv": s * jax.random.normal(ks[1], (out_channels,), jnp.float32),
        "bn_gamma": jnp.ones((out_channels,), jnp.float32),
        "bn_beta": jnp.zeros((out_channels,), jnp.float32),
        "w_fc1": s * jax.random.normal(ks[2], (c_red, out_channels), jnp.float32),
        "b_fc1": s * jax.random.normal(ks[3], (c_red,), jnp.float32),
        "w_fc2": s * jax.random.normal(ks[4], (out_channels, c_red), jnp.float32),
        "b_fc2": s * jax.random.normal(ks[5], (out_channels,), jnp.float32),
    }


def cnn_block_reference(x, params, *, eps=1e-5):
    """Pure-JAX reference mirroring the PyTorch forward (train-mode BN, with conv bias)."""
    w = params["w_conv"]                              # (C_out, C_in, K)
    K = w.shape[2]
    pad = (K - 1) // 2
    y = lax.conv_general_dilated(
        x, w, window_strides=(1,), padding=[(pad, pad)],
        dimension_numbers=("NCH", "OIH", "NCH"),
        precision=lax.Precision.HIGHEST)
    y = y + params["b_conv"][None, :, None]
    mean = jnp.mean(y, axis=(0, 2), keepdims=True)
    var = jnp.mean((y - mean) ** 2, axis=(0, 2), keepdims=True)
    y = (y - mean) / jnp.sqrt(var + eps)
    y = y * params["bn_gamma"][None, :, None] + params["bn_beta"][None, :, None]
    y = jnp.maximum(y, 0.0)
    avg = jnp.mean(y, axis=2)                         # (N, C_out)
    h = jnp.maximum(avg @ params["w_fc1"].T + params["b_fc1"], 0.0)
    g = jax.nn.sigmoid(h @ params["w_fc2"].T + params["b_fc2"])
    return y * g[:, :, None]


# ---------------------------------------------------------------------------
# self-test
# ---------------------------------------------------------------------------
if __name__ == "__main__":
    key = jax.random.PRNGKey(0)
    k1, k2, k3, k4, k5, k6 = jax.random.split(key, 6)

    # Case 1: toy shapes implied by the module (single L tile, masked tail since L<128).
    x1 = jax.random.normal(k1, (2, 4, 16), jnp.float32)           # (N, C_in, L)
    p1 = make_params(k2, 4, 16, 3, 4)
    ref1 = cnn_block_reference(x1, p1)
    out1 = jax.block_until_ready(cnn_block_forward(x1, p1, mxu_dtype=jnp.float32))
    assert out1.shape == (2, 16, 16)
    assert jnp.allclose(out1, ref1, atol=2e-4, rtol=2e-4), \
        float(jnp.max(jnp.abs(out1 - ref1)))
    # default bf16 MXU path (looser tolerance vs the f32 reference)
    out1b = jax.block_until_ready(cnn_block_forward(x1, p1))
    assert jnp.allclose(out1b, ref1, atol=6e-2, rtol=5e-2), \
        float(jnp.max(jnp.abs(out1b - ref1)))

    # Case 2: exercises the (batch, L-tile) grid, cross-tile BN / SE accumulation.
    x2 = jax.random.normal(k3, (2, 3, 256), jnp.float32)
    p2 = make_params(k4, 3, 32, 5, 8)
    ref2 = cnn_block_reference(x2, p2)
    out2 = jax.block_until_ready(cnn_block_forward(x2, p2, l_tile=128, mxu_dtype=jnp.float32))
    assert out2.shape == (2, 32, 256)
    assert jnp.allclose(out2, ref2, atol=2e-4, rtol=2e-4), \
        float(jnp.max(jnp.abs(out2 - ref2)))
    out2b = jax.block_until_ready(cnn_block_forward(x2, p2, l_tile=128))
    assert jnp.allclose(out2b, ref2, atol=6e-2, rtol=5e-2), \
        float(jnp.max(jnp.abs(out2b - ref2)))

    # Case 3: L not a multiple of 128 -> padded + masked tail tile, cropped output.
    x3 = jax.random.normal(k5, (2, 3, 200), jnp.float32)
    p3 = make_params(k6, 3, 32, 5, 8)
    ref3 = cnn_block_reference(x3, p3)
    out3 = jax.block_until_ready(cnn_block_forward(x3, p3, l_tile=128, mxu_dtype=jnp.float32))
    assert out3.shape == (2, 32, 200)
    assert jnp.allclose(out3, ref3, atol=2e-4, rtol=2e-4), \
        float(jnp.max(jnp.abs(out3 - ref3)))

    print("KERNEL_OK")
</pallas_src>

<mosaic_0001>
module attributes {stable_mosaic.version = 11 : i64} {
  func.func @_stats_kernel(%arg0: i32, %arg1: i32, %arg2: memref<1x4x130xf32, #tpu.memory_space<vmem>>, %arg3: memref<16x12xf32, #tpu.memory_space<vmem>>, %arg4: memref<1x16x1xf32, #tpu.memory_space<vmem>>, %arg5: memref<1x16x1xf32, #tpu.memory_space<vmem>>) attributes {dimension_semantics = [#tpu.dimension_semantics<parallel>, #tpu.dimension_semantics<arbitrary>], iteration_bounds = array<i64: 2, 1>, scalar_prefetch = 0 : i64, scratch_operands = 0 : i64, tpu.core_type = #tpu.core_type<tc>, window_params = [{transform_indices = @transform_0, window_bounds = array<i64: 1, 4, 130>}, {pipeline_mode = #tpu.pipeline_mode<synchronous>, transform_indices = @transform_1, window_bounds = array<i64: 16, 12>}, {transform_indices = @transform_2, window_bounds = array<i64: 1, 16, 1>}, {transform_indices = @transform_3, window_bounds = array<i64: 1, 16, 1>}]} {
    %c0_i32 = arith.constant 0 : i32
    %0 = arith.cmpi eq, %arg1, %c0_i32 : i32
    %1 = arith.extui %0 : i1 to i32
    %c0_i32_0 = arith.constant 0 : i32
    %2 = arith.cmpi ne, %1, %c0_i32_0 : i32
    scf.if %2 {
      %cst_20 = arith.constant 0.000000e+00 : f32
      %37 = vector.broadcast %cst_20 : f32 to vector<1x16x1xf32>
      %c0_21 = arith.constant 0 : index
      %c0_22 = arith.constant 0 : index
      %c0_23 = arith.constant 0 : index
      %38 = vector.load %arg4[%c0_21, %c0_22, %c0_23] : memref<1x16x1xf32, #tpu.memory_space<vmem>>, vector<1x16x1xf32>
      tpu.vector_store %arg4[%c0_21, %c0_22, %c0_23], %37 {strides = array<i32>} : memref<1x16x1xf32, #tpu.memory_space<vmem>>, vector<1x16x1xf32>,
      %cst_24 = arith.constant 0.000000e+00 : f32
      %39 = vector.broadcast %cst_24 : f32 to vector<1x16x1xf32>
      %c0_25 = arith.constant 0 : index
      %c0_26 = arith.constant 0 : index
      %c0_27 = arith.constant 0 : index
      %40 = vector.load %arg5[%c0_25, %c0_26, %c0_27] : memref<1x16x1xf32, #tpu.memory_space<vmem>>, vector<1x16x1xf32>
      tpu.vector_store %arg5[%c0_25, %c0_26, %c0_27], %39 {strides = array<i32>} : memref<1x16x1xf32, #tpu.memory_space<vmem>>, vector<1x16x1xf32>,
    } else {
    }
    %c128_i32 = arith.constant 128 : i32
    %3 = arith.muli %arg1, %c128_i32 : i32
    %4 = tpu.assume_multiple %3, 128 : i32
    %c0 = arith.constant 0 : index
    %c0_1 = arith.constant 0 : index
    %5 = arith.index_cast %4 : i32 to index
    %6 = vector.load %arg2[%c0, %c0_1, %5] : memref<1x4x130xf32, #tpu.memory_space<vmem>>, vector<1x4x130xf32>
    %7 = vector.shape_cast %6 : vector<1x4x130xf32> to vector<4x130xf32>
    %8 = vector.extract_strided_slice %7 {offsets = [0, 0], sizes = [4, 128], strides = [1, 1]} : vector<4x130xf32> to vector<4x128xf32>
    %9 = vector.extract_strided_slice %7 {offsets = [0, 1], sizes = [4, 128], strides = [1, 1]} : vector<4x130xf32> to vector<4x128xf32>
    %10 = vector.extract_strided_slice %7 {offsets = [0, 2], sizes = [4, 128], strides = [1, 1]} : vector<4x130xf32> to vector<4x128xf32>
    %11 = tpu.concatenate %8, %9, %10 in 0 : vector<4x128xf32>, vector<4x128xf32>, vector<4x128xf32> -> vector<12x128xf32>
    %c0_2 = arith.constant 0 : index
    %c0_3 = arith.constant 0 : index
    %12 = vector.load %arg3[%c0_2, %c0_3] : memref<16x12xf32, #tpu.memory_space<vmem>>, vector<16x12xf32>
    %cst = arith.constant dense<0.000000e+00> : vector<16x128xf32>
    %13 = tpu.matmul %12, %11, %cst {dimension_numbers = #tpu.dot_dimension_numbers<[1], [0], [0], [1], [0, 0, 1, 1], [], []>} : vector<16x12xf32>, vector<12x128xf32>, vector<16x128xf32> -> vector<16x128xf32>
    %c128_i32_4 = arith.constant 128 : i32
    %14 = arith.muli %arg1, %c128_i32_4 : i32
    %15 = tpu.iota {dimensions = array<i32: 1>} : vector<1x128xi32>
    %16 = vector.broadcast %14 : i32 to vector<1x128xi32>
    %17 = arith.addi %16, %15 : vector<1x128xi32>
    %c16_i32 = arith.constant 16 : i32
    %18 = vector.broadcast %c16_i32 : i32 to vector<1x128xi32>
    %19 = arith.cmpi slt, %17, %18 : vector<1x128xi32>
    %cst_5 = arith.constant 0.000000e+00 : f32
    %20 = vector.shape_cast %19 : vector<1x128xi1> to vector<1x128xi1>
    %21 = vector.broadcast %20 : vector<1x128xi1> to vector<16x128xi1>
    %22 = vector.broadcast %cst_5 : f32 to vector<16x128xf32>
    %23 = arith.select %21, %13, %22 : vector<16x128xi1>, vector<16x128xf32>
    %c0_6 = arith.constant 0 : index
    %c0_7 = arith.constant 0 : index
    %c0_8 = arith.constant 0 : index
    %24 = vector.load %arg4[%c0_6, %c0_7, %c0_8] : memref<1x16x1xf32, #tpu.memory_space<vmem>>, vector<1x16x1xf32>
    %cst_9 = arith.constant dense<0.000000e+00> : vector<16xf32>
    %25 = vector.multi_reduction <add>, %23, %cst_9 [1] : vector<16x128xf32> to vector<16xf32>
    %26 = vector.shape_cast %25 : vector<16xf32> to vector<16x1xf32>
    %27 = vector.shape_cast %26 : vector<16x1xf32> to vector<1x16x1xf32>
    %28 = arith.addf %24, %27 : vector<1x16x1xf32>
    %c0_10 = arith.constant 0 : index
    %c0_11 = arith.constant 0 : index
    %c0_12 = arith.constant 0 : index
    %29 = vector.load %arg4[%c0_10, %c0_11, %c0_12] : memref<1x16x1xf32, #tpu.memory_space<vmem>>, vector<1x16x1xf32>
    tpu.vector_store %arg4[%c0_10, %c0_11, %c0_12], %28 {strides = array<i32>} : memref<1x16x1xf32, #tpu.memory_space<vmem>>, vector<1x16x1xf32>,
    %c0_13 = arith.constant 0 : index
    %c0_14 = arith.constant 0 : index
    %c0_15 = arith.constant 0 : index
    %30 = vector.load %arg5[%c0_13, %c0_14, %c0_15] : memref<1x16x1xf32, #tpu.memory_space<vmem>>, vector<1x16x1xf32>
    %31 = arith.mulf %23, %23 : vector<16x128xf32>
    %cst_16 = arith.constant dense<0.000000e+00> : vector<16xf32>
    %32 = vector.multi_reduction <add>, %31, %cst_16 [1] : vector<16x128xf32> to vector<16xf32>
    %33 = vector.shape_cast %32 : vector<16xf32> to vector<16x1xf32>
    %34 = vector.shape_cast %33 : vector<16x1xf32> to vector<1x16x1xf32>
    %35 = arith.addf %30, %34 : vector<1x16x1xf32>
    %c0_17 = arith.constant 0 : index
    %c0_18 = arith.constant 0 : index
    %c0_19 = arith.constant 0 : index
    %36 = vector.load %arg5[%c0_17, %c0_18, %c0_19] : memref<1x16x1xf32, #tpu.memory_space<vmem>>, vector<1x16x1xf32>
    tpu.vector_store %arg5[%c0_17, %c0_18, %c0_19], %35 {strides = array<i32>} : memref<1x16x1xf32, #tpu.memory_space<vmem>>, vector<1x16x1xf32>,
    return
  }
  func.func @transform_0(%arg0: i32, %arg1: i32) -> (i32, i32, i32) {
    %c0_i32 = arith.constant 0 : i32
    %c0_i32_0 = arith.constant 0 : i32
    %c0_i32_1 = arith.constant 0 : i32
    return %arg0, %c0_i32, %c0_i32_0 : i32, i32, i32
  }
  func.func @transform_1(%arg0: i32, %arg1: i32) -> (i32, i32) {
    %c0_i32 = arith.constant 0 : i32
    %c0_i32_0 = arith.constant 0 : i32
    %c0_i32_1 = arith.constant 0 : i32
    return %c0_i32, %c0_i32_0 : i32, i32
  }
  func.func @transform_2(%arg0: i32, %arg1: i32) -> (i32, i32, i32) {
    %c0_i32 = arith.constant 0 : i32
    %c0_i32_0 = arith.constant 0 : i32
    %c0_i32_1 = arith.constant 0 : i32
    return %arg0, %c0_i32, %c0_i32_0 : i32, i32, i32
  }
  func.func @transform_3(%arg0: i32, %arg1: i32) -> (i32, i32, i32) {
    %c0_i32 = arith.constant 0 : i32
    %c0_i32_0 = arith.constant 0 : i32
    %c0_i32_1 = arith.constant 0 : i32
    return %arg0, %c0_i32, %c0_i32_0 : i32, i32, i32
  }
}

</mosaic_0001>

<bundles_post_ra>
// kernel: tpu_custom_call.1
= control target key start
LH: loop header
LB: loop body
LE: loop exit
PB: predicated region body
PF: predicated region fallthrough
CT: control target
= control target key end

     0   :  { %9 = vsyncpa [#allocation3], 0  ;;  %s942_s0 = inlined_call_operand.hbm [shape: f32[2,4,130], index: 0, kind: input, shape index: {}]   ;;  %s943_s1 = inlined_call_operand.hbm [shape: f32[16,12], index: 1, kind: input, shape index: {}]   ;;  %s944_s2 = inlined_call_operand.vmem [shape: f32[2,16,1], index: 2, kind: output, shape index: {0}]   ;;  %s945_s3 = inlined_call_operand.vmem [shape: f32[2,16,1], index: 3, kind: output, shape index: {1}]  }
   0x1   :  { %11 = vsyncpa [#allocation3 + $0x1], 0 }
   0x2   :  { %12 = vsyncpa [#allocation5], 0  ;;  %s766_s12 = smov 0   ;;  %s768_s13 = smov 0  }
   0x3   :  { %s770_s14 = smov 0   ;;  %s772_s15 = smov 0  }
   0x4   :  { %s774_s16 = smov 0   ;;  %s776_s17 = smov 0  }
   0x5 LB: > { %s500_s18 = sadd.s32 4294967295, %s736_s17   ;;  %p50_p0 = scmp.ne.s32.totalorder %s720_s13, %s716_s12  ;;  %s736_s17 = sphi %s776_s17, %s18_s17   ;;  %s732_s16 = sphi %s774_s16, %s962_s16   ;;  %s728_s15 = sphi %s772_s15, %s961_s15   ;;  %s724_s14 = sphi %s770_s14, %s960_s14   ;;  %s720_s13 = sphi %s768_s13, %s959_s13   ;;  %s716_s12 = sphi %s766_s12, %s958_s12  }
   0x6   : > { %p796_p1 = scmp.eq.s32.totalorder %s500_s18, 0  ;;  %p502_p2 = scmp.ge.s32.totalorder %s736_s17, 1 }
   0x7   : > { %p134_p3 = scmp.lt.s32.totalorder %s736_s17, 3  ;;  %s738_s22 = smov [#allocation4]  }
   0x8   : > { %s950_s19 = scalar_select %p796_p1, 1, 0 }
   0x9   : > { %p804_p4 = por %p796_p1, %p50_p0  ;;  %p808_p5 = pnand %p502_p2, %p134_p3 }
   0xa   : > { %s146_s23 = sshll.u32 %s738_s22, 4  ;;  %s30_s25 = sadd.s32 1, %s732_s16  ;;  %s147_s23 = int_to_ptr.vmem [resolvable:$true] %s146_s23 }
   0xb   : > { %s951_s20 = scalar_select %p804_p4, 1, 0 }
   0xc   : > { %s952_s21 = scalar_select %p808_p5, 1, 0 }
   0xd   : > { %p546_p6 = pneg %p808_p5  ;;  %s624_s28 = scalar_lea.hbm %s943_s1, 256 }
   0xe   : > { %p625_p8 = scmp.ne.s32.totalorder %s943_s1, %s624_s28  ;;  %p631_p12 = scmp.lt.u32.totalorder %s624_s28, %s943_s1 }
   0xf   : > { %p816_p7 = pnand %p546_p6, %p796_p1 }
  0x11   : > { %p626_p9 = pneg %p816_p7 }
  0x13   : > { %p627_p10 = pnand %p626_p9, %p625_p8 }
  0x15   : > { %p628_p11 = pneg %p627_p10 }
  0x17   : > { %p633_p13 = pnand %p631_p12, %p628_p11 }
  0x19   : > { %636 = shalt.err (!%p633_p13)
}
  0x1a   : > { %s637_s6 = scalar_lea.vmem %s147_s23, 256  ;;  %p645_p6 = scmp.lt.s32.totalorder %s147_s23, %s147_s23 }
  0x1b   : > { %p638_p0 = scmp.ne.s32.totalorder %s147_s23, %s637_s6  ;;  %p646_p1 = scmp.lt.s32.totalorder %s637_s6, %s637_s6 }
  0x1d   : > { %p640_p2 = pnand %p638_p0, %p626_p9  ;;  %p647_p4 = por %p646_p1, %p645_p6 }
  0x1f   : > { %p641_p3 = pneg %p640_p2 }
  0x21   : > { %p648_p5 = pnand %p647_p4, %p641_p3 }
  0x23   : > { %651 = shalt.err (!%p648_p5)
}
  0x24   : > { %s739_s7 = smov 128   ;;  %s740_s8 = smov 8  }
  0x25   : > { %549 = dma.hbm_to_vmem [thread:$0]  (!%p816_p7), %s943_s1, 256, %s147_s23, [#allocation5], %s739_s7, %s739_s7, %s740_s8  }
  0x26   : > { %p32_p1 = scmp.ge.s32.totalorder %s30_s25, 2  ;;  %s37_s11 = sadd.s32 1, %s724_s14 }
  0x27   : > { %p44_p4 = scmp.ne.s32.totalorder %s724_s14, %s720_s13  ;;  %p45_p5 = scmp.eq.s32.totalorder %s736_s17, 0 }
  0x28   : > { %s964_s25 = smov (%p32_p1, %s30_s25), 0  ;;  %p555_p9 = scmp.lt.s32.totalorder %s736_s17, 2 }
  0x29   : > { %p46_p8 = por %p45_p5, %p44_p4  ;;  %s34_s12 = ssub.s32 %s732_s16, %s964_s25 }
  0x2a   : > { %s160_s18 = sand.u32 1, %s724_s14   ;;  %p35_p10 = scmp.eq.s32.totalorder %s34_s12, 0 }
  0x2b   : > { %s505_s22 = sshll.u32 %s160_s18, 3  ;;  %s520_s26 = sshll.u32 %s732_s16, 7 }
  0x2c   : > { %s849_s27 = scalar_select %p35_p10, %s724_s14, %s37_s11  }
  0x2d   : > { %s854_s23 = scalar_lea.hbm %s942_s0, %s520_s26  ;;  %s164_s29 = scalar_lea.vmem [#allocation2], %s505_s22 }
  0x2e   : > { %s172_s30 = sshll.u32 %s164_s29, 4  ;;  %p856_p7 = pnand %p555_p9, %p46_p8  ;;  %s860_s30 = int_to_ptr.vmem [resolvable:$true] %s172_s30 }
  0x2f   : > { %s161_s5 = scalar_lea.sflag [#allocation3], %s160_s18  ;;  %s652_s6 = scalar_lea.hbm %s854_s23, 128 }
  0x30   : > { %p653_p11 = scmp.ne.s32.totalorder %s854_s23, %s652_s6  ;;  %p654_p12 = pneg %p856_p7 }
  0x31   : > { %s657_s9 = scalar_lea.hbm %s942_s0, 256  ;;  %p658_p2 = scmp.lt.u32.totalorder %s854_s23, %s942_s0 }
  0x32   : > { %p655_p13 = pnand %p654_p12, %p653_p11  ;;  %p659_p3 = scmp.lt.u32.totalorder %s657_s9, %s652_s6 }
  0x33   : > { %p661_p1 = scmp.lt.u32.totalorder %s652_s6, %s854_s23 }
  0x34   : > { %p656_p0 = pneg %p655_p13  ;;  %p660_p6 = por %p659_p3, %p658_p2 }
  0x36   : > { %p662_p4 = por %p661_p1, %p660_p6 }
  0x38   : > { %p663_p5 = pnand %p662_p4, %p656_p0 }
  0x3a   : > { %666 = shalt.err (!%p663_p5)
}
  0x3b   : > { %s667_s12 = scalar_lea.vmem %s860_s30, 128  ;;  %s741_s18 = smov [#allocation2]  }
  0x3c   : > { %p668_p8 = scmp.ne.s32.totalorder %s860_s30, %s667_s12  ;;  %s672_s22 = sshll.u32 %s741_s18, 4  ;;  %s673_s22 = int_to_ptr.vmem [resolvable:$false] %s672_s22 }
  0x3d   : > { %s674_s26 = scalar_lea.vmem %s673_s22, 256  ;;  %p675_p11 = scmp.lt.s32.totalorder %s860_s30, %s673_s22 }
  0x3e   : > { %p670_p9 = pnand %p668_p8, %p654_p12  ;;  %p676_p13 = scmp.lt.s32.totalorder %s674_s26, %s667_s12 }
  0x40   : > { %p671_p10 = pneg %p670_p9  ;;  %p677_p2 = por %p676_p13, %p675_p11 }
  0x42   : > { %p678_p3 = pnand %p677_p2, %p671_p10 }
  0x44   : > { %681 = shalt.err (!%p678_p3)
}
  0x45   : > { %553 = dma.hbm_to_vmem [thread:$0]  (!%p856_p7), %s854_s23, 128, %s860_s30, %s161_s5  }
  0x46   : > { %p955_p0 = scmp.ne.s32.totalorder %s952_s21, 0 }
  0x47   : > { %s183_s24 = sand.u32 (!%p955_p0), 1, %s720_s13   ;;  %p956_p12 = scmp.ne.s32.totalorder (!%p955_p0), %s951_s20, 0 }
  0x48   : > { %181 = sbr.rel (%p955_p0) target bundleno = 582 (0x246), region = 28  ;;  %s509_s28 = sshll.u32 (!%p955_p0), %s183_s24, 3 }
  0x49   : > { %s184_s29 = scalar_lea.sflag (!%p955_p0), [#allocation3], %s183_s24  ;;  %s187_s6 = scalar_lea.vmem (!%p955_p0), [#allocation2], %s509_s28 }
  0x4f   : > { %707 = dma.done.wait (%p956_p12), %s184_s29, 128  }
  0x50   : > { %709 = vsyncadd (%p956_p12), %s184_s29, 4294967168  ;;  %p957_p6 = scmp.ne.s32.totalorder %s950_s19, 0 }
  0x52   : > { %711 = dma.done.wait (%p957_p6), [#allocation5], 256  }
  0x53   : > { %713 = vsyncadd (%p957_p6), [#allocation5], 4294967040  ;;  %v243_v0 = vld [vmem:[%s187_s6] sm:$0xff]  ;;  %v262_v3 = vld [vmem:[#allocation4] sm:$0xff]  ;;  %vm264_vm0 = vcmask 97280   ;;  %s742_s21 = smov 127   ;;  %v348_v18 = vlaneseq }
  0x54   : > { %v245_v1 = vcombine.low %v243_v0, %v243_v0  ;;  %v253_v2 = vcombine.high %v243_v0, %v243_v0  ;;  %531 = vmatprep.mubr.msk.f32.mxu0 %vm264_vm0, %v262_v3  ;;  %s743_s23 = smov 126   ;;  %vm250_vm1 = vcmask 1039360   ;;  %vm258_vm2 = vcmask 1031168   ;;  %v263_v16 = vld [vmem:[#allocation4 + $0x8] sm:$0xff]  ;;  %p219_p7 = scmp.lt.s32.totalorder %s728_s15, 1 }
  0x55   : > { %vm260_vm3 = vcmask 1043456   ;;  %vm744_vm4 = vmmov 1   ;;  %vm233_vm6 = vcmask 7168   ;;  %v745_v17 = vmov 0.0  }
  0x56   : > { %v612_v4 = vpack.i.bf16 %v243_v0, %v245_v1  ;;  %v617_v5 = vpack.i.bf16 %v253_v2, %v243_v0  ;;  %vm535_vm5 = vmpackc.low %vm260_vm3, %vm744_vm4  ;;  %s966_s15 = smov (!%p219_p7, %s728_s15), 1  ;;  %v349_v19 = vand.u32 127, %v348_v18 }
  0x57   : > { %s521_s19 = sshll.u32 %s966_s15, 4 }
  0x58   : > { %613 = vrot.lane.b32.xlu0 %v612_v4, %s742_s21  ;;  %s905_s4 = scalar_lea.vmem %s944_s2, %s521_s19  ;;  %vm352_vm7 = vcmp.lt.s32.totalorder %v349_v19, 16  ;;  %s228_s7 = scalar_lea.vmem %s945_s3, %s521_s19 }
  0x59   : > { %235 = vst.msk [vmem:[%s905_s4 + $0x8] sm:$0xff] %vm233_vm6, %v745_v17  ;;  %234 = vst.msk [vmem:[%s905_s4] sm:$0xff] %vm233_vm6, %v745_v17 }
  0x5a   : > { %236 = vst.msk [vmem:[%s228_s7] sm:$0xff] %vm233_vm6, %v745_v17  ;;  %237 = vst.msk [vmem:[%s228_s7 + $0x8] sm:$0xff] %vm233_vm6, %v745_v17 }
  0x5c   : > { %618 = vrot.lane.b32.xlu0 %v617_v5, %s743_s23 }
  0x60   : > { %v358_v26 = vld [vmem:[%s905_s4 + $0x8] sm:$0xff]  ;;  %v357_v30 = vld [vmem:[%s905_s4] sm:$0xff] }
  0x61   : > { %v368_v29 = vld [vmem:[%s228_s7] sm:$0xff]  ;;  %v369_v35 = vld [vmem:[%s228_s7 + $0x8] sm:$0xff] }
  0xca   : > { %v614_v6 = vpop.permute.xlu0 %613 }
  0xcb   : > { %v616_v7 = vunpack.i.h.bf16 %v614_v6  ;;  %v615_v8 = vunpack.i.l.bf16 %v614_v6 }
  0xcd   : > { %v251_v10 = vsel %vm250_vm1, %v615_v8, %v616_v7 }
  0xce   : > { %v619_v9 = vpop.permute.xlu0 %618  ;;  %v261_v14 = vsel %vm260_vm3, %v243_v0, %v251_v10 }
  0xcf   : > { %v621_v11 = vunpack.i.h.bf16 %v619_v9  ;;  %v620_v12 = vunpack.i.l.bf16 %v619_v9 }
  0xd1   : > { %v259_v13 = vsel %vm258_vm2, %v620_v12, %v621_v11 }
  0xd2   : > { %v534_v15 = vpack.c.bf16 %v259_v13, %v261_v14 }
  0xd4   : > { %536 = vmatprep.subr.msk.bf16.mxu0 %vm535_vm5, %v534_v15 }
  0xd5   : > { %539 = vmatpush3.bf16.msk.msra.mxu0 %vm535_vm5, %v534_v15 }
  0xd8   : > { %532 = vmatmul.mubr.msk.f32.vlgmr.msra.gmra.mrb[0].mxu0 %vm264_vm0, %v263_v16 }
 0x1ab   : > { %v533_v20 = vpop.f32.mrb[0].mxu0 }
 0x1ac   : > { %v339_v21 = vpop.f32.mrb[1].mxu0  ;;  %v356_v22 = vsel %vm352_vm7, %v533_v20, 0.0 }
 0x1ad   : > { %v355_v23 = vsel %vm352_vm7, %v339_v21, 0.0  ;;  %361 = vadd.xlane.f32.xlu1 %v356_v22  ;;  %v371_v25 = vmul.f32 %v356_v22, %v356_v22 }
 0x1ae   : > { %v370_v24 = vmul.f32 %v355_v23, %v355_v23 }
 0x1b0   : > { %372 = vadd.xlane.f32.xlu0 %v370_v24 }
 0x1b1   : > { %359 = vadd.xlane.f32.xlu1 %v355_v23 }
 0x1b5   : > { %374 = vadd.xlane.f32.xlu1 %v371_v25 }
 0x23a   : > { %v362_v27 = vpop.xlane.xlu1 %361 }
 0x23b   : > { %v364_v28 = vadd.f32 %v362_v27, %v358_v26 }
 0x23d   : > { %367 = vst.msk [vmem:[%s905_s4 + $0x8] sm:$0xff] %vm233_vm6, %v364_v28  ;;  %v373_v31 = vpop.xlane.xlu0 %372 }
 0x23e   : > { %v376_v32 = vadd.f32 %v373_v31, %v368_v29  ;;  %v360_v33 = vpop.xlane.xlu1 %359 }
 0x23f   : > { %v363_v34 = vadd.f32 %v360_v33, %v357_v30 }
 0x240   : > { %378 = vst.msk [vmem:[%s228_s7] sm:$0xff] %vm233_vm6, %v376_v32 }
 0x241   : > { %366 = vst.msk [vmem:[%s905_s4] sm:$0xff] %vm233_vm6, %v363_v34 }
 0x242   : > { %v375_v36 = vpop.xlane.xlu1 %374 }
 0x243   : > { %v377_v37 = vadd.f32 %v375_v36, %v369_v35 }
 0x245   : > { %379 = vst.msk [vmem:[%s228_s7 + $0x8] sm:$0xff] %vm233_vm6, %v377_v37 }
 0x246 PF: > { %s18_s17 = sadd.s32 1, %s736_s17   ;;  %s958_s12 = smov %s720_s13 }
 0x247   : > { %p15_p1 = scmp.ge.s32.totalorder %s18_s17, 4   ;;  %s959_s13 = smov %s724_s14 }
 0x248   : > { %s960_s14 = smov %s849_s27  ;;  %s961_s15 = smov %s732_s16 }
 0x249   : > { %s962_s16 = smov %s964_s25  ;;  %17 = sbr.rel (!%p15_p1) target bundleno = 5 (0x5), region = 89 }
 0x250   :  { %417 = vsyncpa [#allocation3], 1 }
 0x251   :  { %419 = vsyncpa [#allocation3 + $0x1], 1 }
 0x252   :  { %420 = vsyncpa [#allocation5], 1 }

</bundles_post_ra>
